<compile_context>
chip_gen: v7x
topology: tpu7x:2x2x1
jax: 0.10.0
libtpu: 0.0.40
codegen_flags: <defaults>
</compile_context>

<pallas_src>
import jax
import jax.numpy as jnp
from jax.experimental import pallas as pl
from jax.experimental.pallas import tpu as pltpu


def _round_up(x, m):
    return (x + m - 1) // m * m


def critic_kernel(x_ref, w1_ref, b1_ref, wf_ref, bf_ref, o_ref):
    """Fused CriticLayer forward for one batch tile.

    h = LeakyReLU(x @ W1 + b1)              (MXU + VPU)
    y = sum(h * wf, axis=-1) + bf           (VPU mul + XLU lane reduce, no MXU)
    Per-row scalar y is broadcast across 128 lanes so the store is lane-dense;
    the wrapper slices column 0.
    """
    x = x_ref[...]
    h = jnp.dot(x, w1_ref[...], preferred_element_type=jnp.float32) + b1_ref[...]
    h = jnp.maximum(h, 0.01 * h)                                   # LeakyReLU(0.01)
    val = jnp.sum(h * wf_ref[...], axis=-1, keepdims=True)         # (TB, 1)
    # (TB,1) + (1,128) broadcasts -> lane-dense (TB,128) slab.
    o_ref[...] = (val + bf_ref[...]).astype(o_ref.dtype)


def critic_layer_forward(x, params, *, block_b=256):
    """x: (B, input_dim) float32 -> (B, 1) float32."""
    w1, b1, w2, b2, w3, b3, w4, b4 = params
    B, D = x.shape

    # One-time algebraic collapse of the three back-to-back Linears (there is
    # no nonlinearity between them in the PyTorch module):
    #   y = ((h @ w2 + b2) @ w3 + b3) @ w4 + b4 = h @ (w2 @ w3 @ w4) + b_f
    wf = (w2 @ w3 @ w4).T                       # (1, 128)
    bf = b2 @ w3 @ w4 + b3 @ w4 + b4            # (1, 1)
    bf = jnp.broadcast_to(bf, (1, 128))         # replicate scalar across lanes

    # Batch tile: multiple of the f32 sublane (8); pad batch to a whole grid.
    if B >= block_b:
        tb = _round_up(block_b, 8)
    else:
        tb = _round_up(max(B, 1), 8)
    b_pad = _round_up(B, tb)
    if b_pad != B:
        x = jnp.pad(x, ((0, b_pad - B), (0, 0)))

    grid = (b_pad // tb,)
    out = pl.pallas_call(
        critic_kernel,
        out_shape=jax.ShapeDtypeStruct((b_pad, 128), jnp.float32),
        grid_spec=pltpu.PrefetchScalarGridSpec(
            num_scalar_prefetch=0,
            grid=grid,
            in_specs=[
                pl.BlockSpec((tb, D), lambda i: (i, 0)),    # x: tiled over batch
                pl.BlockSpec((D, 128), lambda i: (0, 0)),   # w1: resident
                pl.BlockSpec((1, 128), lambda i: (0, 0)),   # b1: resident
                pl.BlockSpec((1, 128), lambda i: (0, 0)),   # wf: resident
                pl.BlockSpec((1, 128), lambda i: (0, 0)),   # bf: resident
            ],
            out_specs=pl.BlockSpec((tb, 128), lambda i: (i, 0)),
        ),
        compiler_params=pltpu.CompilerParams(
            dimension_semantics=("parallel",),  # shard batch grid across TCs (v7x)
        ),
    )(x, w1, b1, wf, bf)

    return out[:B, :1]


def init_params(key, input_dim, embedding_size):
    """Matches _init_weights: Linear weight ~ N(0, 0.01), bias = 0.
    Weights stored as (in, out) = transpose of PyTorch's (out, in)."""
    k1, k2, k3, k4 = jax.random.split(key, 4)
    std = 0.01

    def lin(k, d_in, d_out):
        w = std * jax.random.normal(k, (d_in, d_out), dtype=jnp.float32)
        b = jnp.zeros((1, d_out), dtype=jnp.float32)
        return w, b

    w1, b1 = lin(k1, input_dim, 128)
    w2, b2 = lin(k2, 128, embedding_size)
    w3, b3 = lin(k3, embedding_size, 128)
    w4, b4 = lin(k4, 128, 1)
    return (w1, b1, w2, b2, w3, b3, w4, b4)


def reference_forward(x, params):
    """Unfused reference matching the PyTorch module order exactly."""
    (w1, b1, w2, b2, w3, b3, w4, b4) = params
    h = x @ w1 + b1
    h = jnp.where(h > 0, h, 0.01 * h)
    e = h @ w2 + b2
    g = e @ w3 + b3
    return g @ w4 + b4


if __name__ == "__main__":
    # Module hyperparameters (small, synthetic).
    sat_all_count = 4
    api_all_count = 8      # unused by forward
    sat_fea_count = 3      # unused by forward
    api_fea_count = 6
    embedding_size = 32
    input_dim = sat_all_count * 7 + api_fea_count * 2   # 4*7 + 6*2 = 40

    key = jax.random.PRNGKey(0)
    k_params, k_x1, k_x2 = jax.random.split(key, 3)
    params = init_params(k_params, input_dim, embedding_size)

    # Case 1: tiny batch (single grid step).
    x1 = jax.random.normal(k_x1, (8, input_dim), dtype=jnp.float32)
    out1 = jax.block_until_ready(critic_layer_forward(x1, params))
    assert out1.shape == (8, 1), out1.shape
    ref1 = reference_forward(x1, params)
    assert jnp.allclose(out1, ref1, atol=1e-6, rtol=1e-4), (out1, ref1)

    # Case 2: ragged batch exercising padding + multi-step grid.
    x2 = jax.random.normal(k_x2, (300, input_dim), dtype=jnp.float32)
    out2 = jax.block_until_ready(critic_layer_forward(x2, params, block_b=128))
    assert out2.shape == (300, 1), out2.shape
    ref2 = reference_forward(x2, params)
    assert jnp.allclose(out2, ref2, atol=1e-6, rtol=1e-4), (out2, ref2)

    print("KERNEL_OK")
</pallas_src>

<mosaic_0001>
module attributes {stable_mosaic.version = 11 : i64} {
  func.func @critic_kernel(%arg0: i32, %arg1: memref<8x40xf32, #tpu.memory_space<vmem>>, %arg2: memref<40x128xf32, #tpu.memory_space<vmem>>, %arg3: memref<1x128xf32, #tpu.memory_space<vmem>>, %arg4: memref<1x128xf32, #tpu.memory_space<vmem>>, %arg5: memref<1x128xf32, #tpu.memory_space<vmem>>, %arg6: memref<8x128xf32, #tpu.memory_space<vmem>>) attributes {dimension_semantics = [#tpu.dimension_semantics<parallel>], iteration_bounds = array<i64: 1>, scalar_prefetch = 0 : i64, scratch_operands = 0 : i64, tpu.core_type = #tpu.core_type<tc>, window_params = [{transform_indices = @transform_0, window_bounds = array<i64: 8, 40>}, {pipeline_mode = #tpu.pipeline_mode<synchronous>, transform_indices = @transform_1, window_bounds = array<i64: 40, 128>}, {pipeline_mode = #tpu.pipeline_mode<synchronous>, transform_indices = @transform_2, window_bounds = array<i64: 1, 128>}, {pipeline_mode = #tpu.pipeline_mode<synchronous>, transform_indices = @transform_3, window_bounds = array<i64: 1, 128>}, {pipeline_mode = #tpu.pipeline_mode<synchronous>, transform_indices = @transform_4, window_bounds = array<i64: 1, 128>}, {transform_indices = @transform_5, window_bounds = array<i64: 8, 128>}]} {
    %c0 = arith.constant 0 : index
    %c0_0 = arith.constant 0 : index
    %0 = vector.load %arg1[%c0, %c0_0] : memref<8x40xf32, #tpu.memory_space<vmem>>, vector<8x40xf32>
    %c0_1 = arith.constant 0 : index
    %c0_2 = arith.constant 0 : index
    %1 = vector.load %arg2[%c0_1, %c0_2] : memref<40x128xf32, #tpu.memory_space<vmem>>, vector<40x128xf32>
    %cst = arith.constant dense<0.000000e+00> : vector<8x128xf32>
    %2 = tpu.matmul %0, %1, %cst {dimension_numbers = #tpu.dot_dimension_numbers<[1], [0], [0], [1], [0, 0, 1, 1], [], []>} : vector<8x40xf32>, vector<40x128xf32>, vector<8x128xf32> -> vector<8x128xf32>
    %c0_3 = arith.constant 0 : index
    %c0_4 = arith.constant 0 : index
    %3 = vector.load %arg3[%c0_3, %c0_4] : memref<1x128xf32, #tpu.memory_space<vmem>>, vector<1x128xf32>
    %4 = vector.broadcast %3 : vector<1x128xf32> to vector<8x128xf32>
    %5 = arith.addf %2, %4 : vector<8x128xf32>
    %cst_5 = arith.constant 0.00999999977 : f32
    %6 = vector.broadcast %cst_5 : f32 to vector<8x128xf32>
    %7 = arith.mulf %6, %5 : vector<8x128xf32>
    %8 = arith.maximumf %5, %7 : vector<8x128xf32>
    %c0_6 = arith.constant 0 : index
    %c0_7 = arith.constant 0 : index
    %9 = vector.load %arg4[%c0_6, %c0_7] : memref<1x128xf32, #tpu.memory_space<vmem>>, vector<1x128xf32>
    %10 = vector.broadcast %9 : vector<1x128xf32> to vector<8x128xf32>
    %11 = arith.mulf %8, %10 : vector<8x128xf32>
    %cst_8 = arith.constant dense<0.000000e+00> : vector<8xf32>
    %12 = vector.multi_reduction <add>, %11, %cst_8 [1] : vector<8x128xf32> to vector<8xf32>
    %13 = vector.shape_cast %12 : vector<8xf32> to vector<8x1xf32>
    %c0_9 = arith.constant 0 : index
    %c0_10 = arith.constant 0 : index
    %14 = vector.load %arg5[%c0_9, %c0_10] : memref<1x128xf32, #tpu.memory_space<vmem>>, vector<1x128xf32>
    %15 = vector.broadcast %13 : vector<8x1xf32> to vector<8x128xf32>
    %16 = vector.broadcast %14 : vector<1x128xf32> to vector<8x128xf32>
    %17 = arith.addf %15, %16 : vector<8x128xf32>
    %c0_11 = arith.constant 0 : index
    %c0_12 = arith.constant 0 : index
    %18 = vector.load %arg6[%c0_11, %c0_12] : memref<8x128xf32, #tpu.memory_space<vmem>>, vector<8x128xf32>
    tpu.vector_store %arg6[%c0_11, %c0_12], %17 {strides = array<i32>} : memref<8x128xf32, #tpu.memory_space<vmem>>, vector<8x128xf32>,
    return
  }
  func.func @transform_0(%arg0: i32) -> (i32, i32) {
    %c0_i32 = arith.constant 0 : i32
    %c0_i32_0 = arith.constant 0 : i32
    return %arg0, %c0_i32 : i32, i32
  }
  func.func @transform_1(%arg0: i32) -> (i32, i32) {
    %c0_i32 = arith.constant 0 : i32
    %c0_i32_0 = arith.constant 0 : i32
    %c0_i32_1 = arith.constant 0 : i32
    return %c0_i32, %c0_i32_0 : i32, i32
  }
  func.func @transform_2(%arg0: i32) -> (i32, i32) {
    %c0_i32 = arith.constant 0 : i32
    %c0_i32_0 = arith.constant 0 : i32
    %c0_i32_1 = arith.constant 0 : i32
    return %c0_i32, %c0_i32_0 : i32, i32
  }
  func.func @transform_3(%arg0: i32) -> (i32, i32) {
    %c0_i32 = arith.constant 0 : i32
    %c0_i32_0 = arith.constant 0 : i32
    %c0_i32_1 = arith.constant 0 : i32
    return %c0_i32, %c0_i32_0 : i32, i32
  }
  func.func @transform_4(%arg0: i32) -> (i32, i32) {
    %c0_i32 = arith.constant 0 : i32
    %c0_i32_0 = arith.constant 0 : i32
    %c0_i32_1 = arith.constant 0 : i32
    return %c0_i32, %c0_i32_0 : i32, i32
  }
  func.func @transform_5(%arg0: i32) -> (i32, i32) {
    %c0_i32 = arith.constant 0 : i32
    %c0_i32_0 = arith.constant 0 : i32
    return %arg0, %c0_i32 : i32, i32
  }
}

</mosaic_0001>

<bundles_post_ra>
// kernel: tpu_custom_call.1
= control target key start
LH: loop header
LB: loop body
LE: loop exit
PB: predicated region body
PF: predicated region fallthrough
CT: control target
= control target key end

     0   :  { %10 = vsyncpa [#allocation3], 0  ;;  %s370_s0 = inlined_call_operand.hbm [shape: f32[8,40], index: 0, kind: input, shape index: {}]   ;;  %s371_s1 = inlined_call_operand.hbm [shape: f32[40,128], index: 1, kind: input, shape index: {}]   ;;  %s372_s2 = inlined_call_operand.vmem [shape: f32[1,128], index: 2, kind: input, shape index: {}]   ;;  %s373_s3 = inlined_call_operand.vmem [shape: f32[1,128], index: 3, kind: input, shape index: {}]   ;;  %s374_s4 = inlined_call_operand.vmem [shape: f32[1,128], index: 4, kind: input, shape index: {}]   ;;  %s375_s5 = inlined_call_operand.hbm [shape: f32[8,128], index: 5, kind: output, shape index: {}]  }
   0x1   :  { %11 = vsyncpa [#allocation6], 0 }
   0x2   :  { %12 = vsyncpa [#allocation4], 0  ;;  %s280_s18 = smov [#allocation2]   ;;  %s281_s20 = smov [#allocation5]  }
   0x3   :  { %s19_s19 = sshll.u32 %s280_s18, 4  ;;  %s28_s21 = sshll.u32 %s281_s20, 4  ;;  %s20_s19 = int_to_ptr.vmem [resolvable:$true] %s19_s19  ;;  %s318_s21 = int_to_ptr.vmem [resolvable:$true] %s28_s21 }
   0x4   :  { %s208_s24 = scalar_lea.hbm %s370_s0, 128 }
   0x5   :  { %p209_p0 = scmp.ne.s32.totalorder %s370_s0, %s208_s24  ;;  %p212_p1 = scmp.lt.u32.totalorder %s208_s24, %s370_s0 }
   0x7   :  { %p214_p2 = pnand %p212_p1, %p209_p0 }
   0x9   :  { %217 = shalt.err (!%p214_p2)
}
   0xa   :  { %s218_s29 = scalar_lea.vmem %s20_s19, 128  ;;  %p223_p4 = scmp.lt.s32.totalorder %s20_s19, %s20_s19 }
   0xb   :  { %p219_p3 = scmp.ne.s32.totalorder %s20_s19, %s218_s29  ;;  %p224_p5 = scmp.lt.s32.totalorder %s218_s29, %s218_s29 }
   0xd   :  { %p225_p6 = por %p224_p5, %p223_p4 }
   0xf   :  { %p226_p7 = pnand %p225_p6, %p219_p3 }
  0x11   :  { %229 = shalt.err (!%p226_p7)
}
  0x12   :  { %22 = dma.hbm_to_vmem [thread:$0]  %s370_s0, 128, %s20_s19, [#allocation3]  }
  0x13   :  { %s230_s9 = scalar_lea.hbm %s371_s1, 640 }
  0x14   :  { %p231_p8 = scmp.ne.s32.totalorder %s371_s1, %s230_s9  ;;  %p234_p9 = scmp.lt.u32.totalorder %s230_s9, %s371_s1 }
  0x16   :  { %p236_p10 = pnand %p234_p9, %p231_p8 }
  0x18   :  { %239 = shalt.err (!%p236_p10)
}
  0x19   :  { %s240_s14 = scalar_lea.vmem %s318_s21, 640  ;;  %p245_p12 = scmp.lt.s32.totalorder %s318_s21, %s318_s21 }
  0x1a   :  { %p241_p11 = scmp.ne.s32.totalorder %s318_s21, %s240_s14  ;;  %p246_p13 = scmp.lt.s32.totalorder %s240_s14, %s240_s14 }
  0x1c   :  { %p247_p0 = por %p246_p13, %p245_p12 }
  0x1e   :  { %p248_p1 = pnand %p247_p0, %p241_p11 }
  0x20   :  { %251 = shalt.err (!%p248_p1)
}
  0x21   :  { %s282_s0 = smov 128   ;;  %s283_s15 = smov 8  }
  0x22   :  { %34 = dma.hbm_to_vmem [thread:$0]  %s371_s1, 640, %s318_s21, [#allocation6], %s282_s0, %s282_s0, %s283_s15  }
  0x23   :  { %274 = dma.done.wait [#allocation3], 128  }
  0x24   :  { %275 = vsyncadd [#allocation3], 4294967168 }
  0x25   :  { %276 = dma.done.wait [#allocation6], 640  }
  0x26   :  { %277 = vsyncadd [#allocation6], 4294966656  ;;  %v284_v0 = vmov 0.0|0.0   ;;  %vm285_vm0 = vmmov 0   ;;  %v286_v1 = vmov 0.0   ;;  %v48_v2 = vld [vmem:[#allocation5] sm:$0xff] }
  0x27   :  { %194 = vmatprep.subr.bf16.mxu0 %v284_v0  ;;  %191 = vmatprep.mubr.msk.f32.mxu0 %vm285_vm0, %v286_v1  ;;  %v49_v3 = vld [vmem:[#allocation5 + $0x8] sm:$0xff]  ;;  %v50_v4 = vld [vmem:[#allocation5 + $0x10] sm:$0xff]  ;;  %v51_v6 = vld [vmem:[#allocation5 + $0x18] sm:$0xff]  ;;  %vm60_vm1 = vcmask 326656   ;;  %s287_s23 = smov [#allocation7]  }
  0x28   :  { %v195_v5 = vpack.c.bf16 %v49_v3, %v48_v2  ;;  %v198_v7 = vpack.c.bf16 %v51_v6, %v50_v4  ;;  %v52_v8 = vld [vmem:[#allocation5 + $0x20] sm:$0xff]  ;;  %v47_v9 = vld [vmem:[#allocation2] sm:$0xff]  ;;  %s161_s24 = sshll.u32 %s287_s23, 4  ;;  %s162_s24 = int_to_ptr.vmem [resolvable:$true] %s161_s24 }
  0x29   :  { %v171_v10 = vld [vmem:[%s372_s2] ss:$0 sm:$0xff]  ;;  %s252_s2 = scalar_lea.vmem %s162_s24, 128  ;;  %p257_p3 = scmp.lt.s32.totalorder %s162_s24, %s162_s24 }
  0x2a   :  { %196 = vmatpush3.bf16.msra.mxu0 %v195_v5  ;;  %v173_v15 = vld [vmem:[%s373_s3] ss:$0 sm:$0xff]  ;;  %p253_p2 = scmp.ne.s32.totalorder %s162_s24, %s252_s2  ;;  %p258_p4 = scmp.lt.s32.totalorder %s252_s2, %s252_s2 }
  0x2b   :  { %197 = vmatprep.subr.bf16.mxu0 %v284_v0  ;;  %v174_v18 = vld [vmem:[%s374_s4] ss:$0 sm:$0xff] }
  0x2c   :  { %p259_p5 = por %p258_p4, %p257_p3 }
  0x2e   :  { %199 = vmatpush3.bf16.msra.mxu0 %v198_v7  ;;  %p260_p6 = pnand %p259_p5, %p253_p2 }
  0x2f   :  { %189 = vmatprep.subr.mxu0 %v286_v1 }
  0x32   :  { %190 = vmatpush3.msra.mxu0 %v52_v8 }
  0x33   :  { %192 = vmatmul.mubr.msk.f32.vlgmr.msra.gmra.mrb[0].mxu0 %vm60_vm1, %v47_v9 }
 0x106   :  { %v130_v11 = vpop.f32.mrb[0].mxu0 }
 0x107   :  { %v131_v12 = vadd.f32 %v171_v10, %v130_v11  ;;  %v193_v13 = vpop.f32.mrb[1].mxu0 }
 0x109   :  { %v134_v14 = vmul.f32 0.01, %v131_v12 }
 0x10b   :  { %v135_v16 = vmax.f32 %v131_v12, %v134_v14 }
 0x10d   :  { %v143_v17 = vmul.f32 %v173_v15, %v135_v16 }
 0x10f   :  { %144 = vadd.xlane.f32.xlu0 %v143_v17 }
 0x19c   :  { %v145_v19 = vpop.xlane.xlu0 %144 }
 0x19d   :  { %v153_v20 = vadd.f32 %v174_v18, %v145_v19 }
 0x19f   :  { %154 = vst [vmem:[#allocation7] sm:$0xff] %v153_v20 }
 0x1a0   :  { %263 = shalt.err (!%p260_p6)
}
 0x1a1   :  { %s264_s26 = scalar_lea.hbm %s375_s5, 128 }
 0x1a2   :  { %p265_p7 = scmp.ne.s32.totalorder %s375_s5, %s264_s26  ;;  %p268_p8 = scmp.lt.u32.totalorder %s264_s26, %s375_s5 }
 0x1a4   :  { %p270_p9 = pnand %p268_p8, %p265_p7 }
 0x1a6   :  { %273 = shalt.err (!%p270_p9)
}
 0x1a7   :  { %164 = dma.vmem_to_hbm [thread:$0]  %s162_s24, 128, %s375_s5, [#allocation4]  }
 0x1a8   :  { %278 = dma.done.wait [#allocation4], 128  }
 0x1a9   :  { %279 = vsyncadd [#allocation4], 4294967168 }
 0x1aa   :  { %168 = vsyncpa [#allocation3], 1 }
 0x1ab   :  { %169 = vsyncpa [#allocation6], 1 }
 0x1ac   :  { %170 = vsyncpa [#allocation4], 1 }

</bundles_post_ra>
